<compile_context>
chip_gen: v6e
topology: v6e:2x2x1
jax: 0.10.0
libtpu: 0.0.40
codegen_flags: <defaults>
</compile_context>

<pallas_src>
import functools

import jax
import jax.numpy as jnp
from jax.experimental import pallas as pl
from jax.experimental.pallas import tpu as pltpu


def _crop_kernel(x_ref, o_ref, *, trim, target_length):
    # x_ref: (1, C_blk, L)   input block (full length in lanes)
    # o_ref: (1, C_blk, T)   cropped output block
    o_ref[...] = x_ref[:, :, trim:trim + target_length]


def _pick_channel_tile(C, L, itemsize, budget_bytes=2 << 20):
    """Largest multiple-of-8 divisor of C whose (tile, L) block fits the budget."""
    if C % 8 != 0:
        return C  # must use the full dim to satisfy the (8, 128) block rule
    divisors = [d for d in range(8, C + 1, 8) if C % d == 0]
    if not divisors:
        return C
    fitting = [d for d in divisors if d * L * itemsize <= budget_bytes]
    return max(fitting) if fitting else min(divisors)


def _crop_3d(x, target_length, trim):
    B, C, L = x.shape
    T = target_length
    C_blk = _pick_channel_tile(C, L, x.dtype.itemsize)

    kernel = functools.partial(_crop_kernel, trim=trim, target_length=T)
    grid_spec = pltpu.PrefetchScalarGridSpec(
        num_scalar_prefetch=0,
        grid=(B, C // C_blk),
        in_specs=[pl.BlockSpec((1, C_blk, L), lambda b, c: (b, c, 0))],
        out_specs=pl.BlockSpec((1, C_blk, T), lambda b, c: (b, c, 0)),
    )
    return pl.pallas_call(
        kernel,
        out_shape=jax.ShapeDtypeStruct((B, C, T), x.dtype),
        grid_spec=grid_spec,
        compiler_params=pltpu.CompilerParams(
            dimension_semantics=("parallel", "parallel")),
    )(x)


def target_length_crop_1d(x, target_percentage):
    """Forward pass of TargetLengthCrop1D for 2D (B, L) or 3D (B, C, L) inputs."""
    L = x.shape[-1]
    target_length = int(L * target_percentage)
    assert 0 < target_length <= L, "only cropping (target_percentage <= 1) supported"
    trim = (L - target_length) // 2

    if x.ndim > 2:
        return _crop_3d(x, target_length, trim)
    elif x.ndim == 2:
        B = x.shape[0]
        out = _crop_3d(x.reshape(1, B, L), target_length, trim)  # free reshape
        return out.reshape(B, target_length)
    else:
        raise ValueError("TargetLengthCrop1D expects a 2D or 3D input")


def ref_target_length_crop_1d(x, target_percentage):
    """Pure-JAX transcription of the PyTorch forward."""
    L = x.shape[-1]
    target_length = int(L * target_percentage)
    trim = (L - target_length) // 2
    if x.ndim > 2:
        return x[:, :, trim:trim + target_length]
    return x[:, trim:trim + target_length]


if __name__ == "__main__":
    key = jax.random.PRNGKey(0)
    k1, k2, k3 = jax.random.split(key, 3)
    ok = True

    # 3D case: (B, C, L) = (2, 4, 16), several crop percentages (incl. no-op crop).
    x3 = jax.random.normal(k1, (2, 4, 16), dtype=jnp.float32)
    for pct in (0.75, 0.5, 1.0):
        out = jax.block_until_ready(target_length_crop_1d(x3, pct))
        ref = ref_target_length_crop_1d(x3, pct)
        ok &= out.shape == ref.shape and bool(jnp.array_equal(out, ref))

    # 3D case with C a multiple of 8 (exercises the channel-tile path).
    x3b = jax.random.normal(k2, (2, 16, 32), dtype=jnp.float32)
    out = jax.block_until_ready(target_length_crop_1d(x3b, 0.875))
    ref = ref_target_length_crop_1d(x3b, 0.875)
    ok &= out.shape == ref.shape and bool(jnp.array_equal(out, ref))

    # 2D case: (B, L) = (2, 16).
    x2 = jax.random.normal(k3, (2, 16), dtype=jnp.float32)
    out = jax.block_until_ready(target_length_crop_1d(x2, 0.75))
    ref = ref_target_length_crop_1d(x2, 0.75)
    ok &= out.shape == ref.shape and bool(jnp.array_equal(out, ref))

    if ok:
        print("KERNEL_OK")
    else:
        raise SystemExit("mismatch between Pallas kernel and reference")
</pallas_src>

<mosaic_0001>
module attributes {stable_mosaic.version = 11 : i64} {
  func.func @_crop_kernel(%arg0: i32, %arg1: i32, %arg2: memref<1x4x16xf32, #tpu.memory_space<vmem>>, %arg3: memref<1x4x12xf32, #tpu.memory_space<vmem>>) attributes {dimension_semantics = [#tpu.dimension_semantics<parallel>, #tpu.dimension_semantics<parallel>], iteration_bounds = array<i64: 2, 1>, scalar_prefetch = 0 : i64, scratch_operands = 0 : i64, tpu.core_type = #tpu.core_type<tc>, window_params = [{transform_indices = @transform_0, window_bounds = array<i64: 1, 4, 16>}, {transform_indices = @transform_1, window_bounds = array<i64: 1, 4, 12>}]} {
    %c0 = arith.constant 0 : index
    %c0_0 = arith.constant 0 : index
    %c2 = arith.constant 2 : index
    %0 = vector.load %arg2[%c0, %c0_0, %c2] : memref<1x4x16xf32, #tpu.memory_space<vmem>>, vector<1x4x12xf32>
    %c0_1 = arith.constant 0 : index
    %c0_2 = arith.constant 0 : index
    %c0_3 = arith.constant 0 : index
    %1 = vector.load %arg3[%c0_1, %c0_2, %c0_3] : memref<1x4x12xf32, #tpu.memory_space<vmem>>, vector<1x4x12xf32>
    tpu.vector_store %arg3[%c0_1, %c0_2, %c0_3], %0 {strides = array<i32>} : memref<1x4x12xf32, #tpu.memory_space<vmem>>, vector<1x4x12xf32>,
    return
  }
  func.func @transform_0(%arg0: i32, %arg1: i32) -> (i32, i32, i32) {
    %c0_i32 = arith.constant 0 : i32
    %c0_i32_0 = arith.constant 0 : i32
    return %arg0, %arg1, %c0_i32 : i32, i32, i32
  }
  func.func @transform_1(%arg0: i32, %arg1: i32) -> (i32, i32, i32) {
    %c0_i32 = arith.constant 0 : i32
    %c0_i32_0 = arith.constant 0 : i32
    return %arg0, %arg1, %c0_i32 : i32, i32, i32
  }
}

</mosaic_0001>

<bundles_post_ra>
// kernel: tpu_custom_call.1
= control target key start
LH: loop header
LB: loop body
LE: loop exit
PB: predicated region body
PF: predicated region fallthrough
CT: control target
= control target key end

     0   :  { %6 = vsyncpa [#allocation3], 0  ;;  %s590_s0 = inlined_call_operand.hbm [shape: f32[2,4,16], index: 0, kind: input, shape index: {}]   ;;  %s591_s1 = inlined_call_operand.hbm [shape: f32[2,4,12], index: 1, kind: output, shape index: {}]  }
   0x1   :  { %8 = vsyncpa [#allocation3 + $0x1], 0 }
   0x2   :  { %9 = vsyncpa [#allocation4], 0 }
   0x3   :  { %11 = vsyncpa [#allocation4 + $0x1], 0  ;;  %s450_s6 = smov 0   ;;  %s452_s7 = smov 0  }
   0x4   :  { %s454_s8 = smov 0   ;;  %s456_s9 = smov 0  }
   0x5   :  { %s458_s10 = smov 0   ;;  %s460_s11 = smov 0  }
   0x6 LB: > { %s251_s12 = sadd.s32 4294967295, %s435_s11   ;;  %s252_s13 = sadd.s32 4294967294, %s435_s11   ;;  %s435_s11 = sphi %s460_s11, %s17_s11   ;;  %s431_s10 = sphi %s458_s10, %s603_s10   ;;  %s427_s9 = sphi %s456_s9, %s602_s9   ;;  %s423_s8 = sphi %s454_s8, %s601_s8   ;;  %s419_s7 = sphi %s452_s7, %s600_s7   ;;  %s415_s6 = sphi %s450_s6, %s599_s6  }
   0x7   : > { %s29_s14 = sadd.s32 1, %s431_s10  ;;  %s38_s15 = sadd.s32 1, %s423_s8 }
   0x8   : > { %p31_p0 = scmp.ge.s32.totalorder %s29_s14, 2  ;;  %p45_p1 = scmp.ne.s32.totalorder %s423_s8, %s419_s7 }
   0x9   : > { %p46_p2 = scmp.eq.s32.totalorder %s435_s11, 0  ;;  %p51_p3 = scmp.ne.s32.totalorder %s419_s7, %s415_s6 }
   0xa   : > { %s605_s14 = smov (%p31_p0, %s29_s14), 0  ;;  %p52_p5 = scmp.eq.s32.totalorder %s251_s12, 0 }
   0xb   : > { %p491_p4 = por %p46_p2, %p45_p1  ;;  %s33_s17 = ssub.s32 %s431_s10, %s605_s14 }
   0xc   : > { %p77_p6 = scmp.eq.s32.totalorder %s251_s12, 1  ;;  %p36_p7 = scmp.eq.s32.totalorder %s33_s17, 0 }
   0xd   : > { %p497_p8 = por %p52_p5, %p51_p3  ;;  %p83_p10 = scmp.eq.s32.totalorder %s252_s13, 1 }
   0xe   : > { %p501_p9 = por %p77_p6, %p45_p1  ;;  %p276_p13 = scmp.lt.s32.totalorder %s435_s11, 2 }
   0xf   : > { %s506_s20 = scalar_select %p36_p7, %s423_s8, %s38_s15  }
  0x10   : > { %p508_p11 = por %p83_p10, %p51_p3  ;;  %s103_s22 = sand.u32 1, %s423_s8  }
  0x11   : > { %s255_s23 = sshll.u32 %s103_s22, 2  ;;  %s256_s24 = sshll.u32 %s431_s10, 6 }
  0x12   : > { %s595_s21 = scalar_select %p508_p11, 1, 0 }
  0x13   : > { %s113_s27 = scalar_lea.hbm %s590_s0, %s256_s24  ;;  %s107_s28 = scalar_lea.vmem [#allocation2], %s255_s23 }
  0x14   : > { %s115_s29 = sshll.u32 %s107_s28, 4  ;;  %p521_p0 = pnand %p276_p13, %p491_p4  ;;  %s116_s29 = int_to_ptr.vmem [resolvable:$true] %s115_s29 }
  0x15   : > { %p257_p1 = scmp.ge.s32.totalorder %s435_s11, 1  ;;  %p120_p2 = scmp.lt.s32.totalorder %s435_s11, 3 }
  0x16   : > { %s104_s2 = scalar_lea.sflag [#allocation3], %s103_s22  ;;  %p329_p3 = pneg %p521_p0 }
  0x17   : > { %s340_s3 = scalar_lea.vmem %s116_s29, 64  ;;  %s437_s4 = smov [#allocation2]  }
  0x18   : > { %p341_p5 = scmp.ne.s32.totalorder %s116_s29, %s340_s3  ;;  %s345_s5 = sshll.u32 %s437_s4, 4  ;;  %s346_s5 = int_to_ptr.vmem [resolvable:$false] %s345_s5 }
  0x19   : > { %s347_s12 = scalar_lea.vmem %s346_s5, 128  ;;  %p348_p10 = scmp.lt.s32.totalorder %s116_s29, %s346_s5 }
  0x1a   : > { %p343_p6 = pnand %p341_p5, %p329_p3  ;;  %p349_p12 = scmp.lt.s32.totalorder %s347_s12, %s340_s3 }
  0x1c   : > { %p344_p7 = pneg %p343_p6  ;;  %p350_p4 = por %p349_p12, %p348_p10 }
  0x1e   : > { %p351_p13 = pnand %p350_p4, %p344_p7 }
  0x20   : > { %354 = shalt.err (!%p351_p13)
}
  0x21   : > { %271 = dma.hbm_to_vmem [thread:$0]  (!%p521_p0), %s113_s27, 64, %s116_s29, %s104_s2  }
  0x22   : > { %p121_p11 = pnand %p257_p1, %p120_p2 }
  0x23   : > { %s536_s13 = sand.u32 (!%p121_p11), 1, %s419_s7  }
  0x24   : > { %124 = sbr.rel (%p121_p11) target bundleno = 171 (0xab), region = 24  ;;  %s258_s15 = sshll.u32 (!%p121_p11), %s536_s13, 2 }
  0x25   : > { %s127_s16 = scalar_lea.sflag (!%p121_p11), [#allocation3], %s536_s13  ;;  %s130_s17 = scalar_lea.vmem (!%p121_p11), [#allocation2], %s258_s15 }
  0x29   : > { %406 = dma.done.wait (%p497_p8), %s127_s16, 64  }
  0x2a   : > { %408 = vsyncadd (%p497_p8), %s127_s16, 4294967232  ;;  %v149_v0 = vld [vmem:[%s130_s17] sm:$0xf]  ;;  %s438_s22 = smov 126   ;;  %s261_s23 = sshll.u32 %s427_s9, 6  ;;  %vm154_vm0 = vcmask 93184  }
  0x2b   : > { %151 = vrot.lane.b32.xlu0 %v149_v0, %s438_s22  ;;  %s148_s24 = scalar_lea.vmem [#allocation5], %s258_s15  ;;  %s548_s28 = scalar_lea.hbm %s591_s1, %s261_s23 }
  0x2c   : > { %s171_s25 = sshll.u32 %s148_s24, 4  ;;  %s157_s18 = scalar_lea.sflag [#allocation4], %s536_s13  ;;  %s172_s25 = int_to_ptr.vmem [resolvable:$true] %s171_s25 }
  0x2d   : > { %s355_s29 = scalar_lea.vmem %s172_s25, 64  ;;  %s439_s30 = smov [#allocation5]  }
  0x2e   : > { %p356_p8 = scmp.ne.s32.totalorder %s172_s25, %s355_s29  ;;  %s359_s2 = sshll.u32 %s439_s30, 4  ;;  %s360_s2 = int_to_ptr.vmem [resolvable:$false] %s359_s2 }
  0x2f   : > { %s361_s9 = scalar_lea.vmem %s360_s2, 128  ;;  %p362_p0 = scmp.lt.s32.totalorder %s172_s25, %s360_s2 }
  0x30   : > { %p357_p11 = pnand %p356_p8, %p501_p9  ;;  %p363_p1 = scmp.lt.s32.totalorder %s361_s9, %s355_s29 }
  0x32   : > { %p358_p12 = pneg %p357_p11  ;;  %p364_p2 = por %p363_p1, %p362_p0 }
  0x34   : > { %p365_p3 = pnand %p364_p2, %p358_p12 }
  0x9d   : > { %v152_v1 = vpop.permute.xlu0 %151 }
  0x9e   : > { %155 = vst.msk [vmem:[%s148_s24] sm:$0xf] %vm154_vm0, %v152_v1 }
  0x9f   : > { %368 = shalt.err (!%p365_p3)
}
  0xa0   : > { %s369_s3 = scalar_lea.hbm %s548_s28, 64  ;;  %s373_s12 = scalar_lea.hbm %s591_s1, 128 }
  0xa1   : > { %p370_p5 = scmp.ne.s32.totalorder %s548_s28, %s369_s3  ;;  %p374_p10 = scmp.lt.s32.totalorder %s548_s28, %s591_s1 }
  0xa2   : > { %p375_p4 = scmp.lt.s32.totalorder %s373_s12, %s369_s3 }
  0xa3   : > { %p371_p6 = pnand %p370_p5, %p501_p9 }
  0xa4   : > { %p376_p13 = por %p375_p4, %p374_p10 }
  0xa5   : > { %p372_p7 = pneg %p371_p6 }
  0xa7   : > { %p377_p8 = pnand %p376_p13, %p372_p7 }
  0xa9   : > { %380 = shalt.err (!%p377_p8)
}
  0xaa   : > { %266 = dma.vmem_to_hbm [thread:$0]  (%p501_p9), %s172_s25, 64, %s548_s28, %s157_s18  }
  0xab PF: > { %s183_s16 = sand.u32 1, %s415_s6   ;;  %p597_p11 = scmp.ne.s32.totalorder %s595_s21, 0 }
  0xac   : > { %p598_p12 = scmp.ge.s32.totalorder %s435_s11, 2  ;;  %s184_s17 = scalar_lea.sflag [#allocation4], %s183_s16 }
  0xae   : > { %p273_p0 = pnand %p598_p12, %p597_p11 }
  0xb0   : > { %p274_p1 = pneg %p273_p0 }
  0xb2   : > { %410 = dma.done.wait (%p274_p1), %s184_s17, 64  }
  0xb3   : > { %412 = vsyncadd (%p274_p1), %s184_s17, 4294967232  ;;  %s17_s11 = sadd.s32 1, %s435_s11   ;;  %s599_s6 = smov %s419_s7 }
  0xb4   : > { %p14_p2 = scmp.ge.s32.totalorder %s17_s11, 4   ;;  %s600_s7 = smov %s423_s8 }
  0xb5   : > { %s601_s8 = smov %s506_s20  ;;  %s602_s9 = smov %s431_s10 }
  0xb6   : > { %s603_s10 = smov %s605_s14  ;;  %16 = sbr.rel (!%p14_p2) target bundleno = 6 (0x6), region = 69 }
  0xbb   :  { %189 = vsyncpa [#allocation3], 1 }
  0xbc   :  { %191 = vsyncpa [#allocation3 + $0x1], 1 }
  0xbd   :  { %192 = vsyncpa [#allocation4], 1 }
  0xbe   :  { %194 = vsyncpa [#allocation4 + $0x1], 1 }

</bundles_post_ra>
